<compile_context>
chip_gen: v6e
topology: v6e:2x2x1
jax: 0.10.0
libtpu: 0.0.40
codegen_flags: <defaults>
</compile_context>

<pallas_src>
import functools

import jax
import jax.numpy as jnp
from jax.experimental import pallas as pl
from jax.experimental.pallas import tpu as pltpu


def _round_up(x, m):
    return ((x + m - 1) // m) * m


def _cdiv(a, b):
    return (a + b - 1) // b


# --------------------------------------------------------------------------
# Fused kernel: all projection layers for one (batch, row-tile) block.
# --------------------------------------------------------------------------
def _prenet_fused_kernel(n_layers, h_dim, x_ref, bias_ref, *rest):
    """
    x_ref    : (1, T_tile, D_in)   f32    input rows (mel features, unpadded)
    bias_ref : (1, L, H_pad)       f32    per-layer folded bias (fc_b + speaker)
    rest     : L weight refs, (in, H_pad) bf16, pre-transposed; then o_ref
    o_ref    : (1, T_tile, H)      out_dtype
    """
    w_refs = rest[:n_layers]
    o_ref = rest[n_layers]

    # Cast the f32 input rows to bf16 in VMEM (MXU fast path); accumulation
    # and the bias+ReLU epilogue stay in f32 (safe on v5e: no bf16 VPU).
    h = x_ref[0].astype(jnp.bfloat16)                     # (T_tile, D_in)

    for l in range(n_layers):                             # static unroll
        # MXU matmul: bf16 inputs, f32 accumulation.  Weights already (in, out).
        y = jnp.dot(h, w_refs[l][...], preferred_element_type=jnp.float32)
        # Per-layer folded bias loaded here (short live range) + ReLU, in f32.
        y = jnp.maximum(y + bias_ref[:, l, :], 0.0)       # (T_tile,H_pad)+(1,H_pad)
        # Next layer consumes bf16; final layer stays f32 until the store cast.
        h = y.astype(jnp.bfloat16) if l + 1 < n_layers else y

    o_ref[0] = h[:, :h_dim].astype(o_ref.dtype)


# --------------------------------------------------------------------------
# Host-side parameter glue — compute ONCE per (params, speaker) and reuse.
# --------------------------------------------------------------------------
def prepare_prenet_params(params, speaker_embedding):
    """Weight-norm reconstruction, speaker-bias folding, transpose/pad/cast.

    Returns a dict that can be cached across decode steps / training steps for
    a fixed utterance (speaker embedding); prenet_apply only runs the kernel.
    """
    H = params[0]["w"].shape[0]
    L = len(params)
    H_pad = _round_up(H, 128)

    w_p, biases = [], []
    for i, p in enumerate(params):
        # weight_norm reconstruction: ws[j,:] = g[j] * v[j,:] / ||v[j,:]||
        row_norm = jnp.linalg.norm(p["v"], axis=1, keepdims=True)
        ws = p["v"] * (p["g"][:, None] / row_norm)
        # Speaker branch: tiny (B,S)x(S,H) matmul + softsign — hoisted out of
        # the kernel and folded with the fc bias.
        s = speaker_embedding @ ws.T + p["bs"]
        s = s / (1.0 + jnp.abs(s))                        # softsign
        biases.append(p["b"][None, :] + s)                # (B, H)

        wt = p["w"].T.astype(jnp.bfloat16)                # (in_dim, H)
        in_dim = wt.shape[0]
        # Layer 0 keeps its true (unpadded) input rows; hidden layers consume
        # the H_pad-wide activation so their input rows are zero-padded.
        in_rows = in_dim if i == 0 else H_pad
        w_p.append(jnp.zeros((in_rows, H_pad), jnp.bfloat16)
                   .at[:in_dim, :H].set(wt))

    B = speaker_embedding.shape[0]
    bias_p = jnp.zeros((B, L, H_pad), jnp.float32).at[:, :, :H].set(
        jnp.stack(biases, axis=1))

    return dict(weights=tuple(w_p), bias=bias_p, hidden_dim=H, n_layers=L)


# --------------------------------------------------------------------------
# Kernel launcher.
# --------------------------------------------------------------------------
def prenet_apply(prepared, x, *, row_tile=512, out_dtype=jnp.bfloat16):
    """x: (B, T, mel_spec_dim) f32  ->  (B, T, hidden_dim) out_dtype.

    Use out_dtype=jnp.float32 for strict dtype parity with the PyTorch module
    (the bf16 default halves the dominant HBM writeback).
    """
    B, T, D0 = x.shape
    H = prepared["hidden_dim"]
    L = prepared["n_layers"]
    w_p = prepared["weights"]
    bias_p = prepared["bias"]
    H_pad = w_p[0].shape[1]

    # ---- row tiling: no T padding in HBM; ragged last block masked on write ----
    if T <= row_tile:
        t_tile = T                          # block == full dim: always legal
    else:
        t_tile = _round_up(row_tile, 16)    # multiple of 16: bf16 sublane packing
    # v7x has 2 TensorCores: keep >= 2 parallel grid blocks when possible.
    if B * _cdiv(T, t_tile) < 2 and T >= 32:
        t_tile = _round_up(_cdiv(T, 2), 16)

    grid = (B, _cdiv(T, t_tile))

    in_specs = [
        pl.BlockSpec((1, t_tile, D0), lambda b, t: (b, t, 0)),   # x rows (f32)
        pl.BlockSpec((1, L, H_pad), lambda b, t: (b, 0, 0)),     # folded bias
    ]
    for w in w_p:                                                # grid-invariant
        in_specs.append(pl.BlockSpec(w.shape, lambda b, t: (0, 0)))

    # ---- VMEM budget: only raise the scoped limit if the estimate needs it ----
    out_bytes = jnp.dtype(out_dtype).itemsize
    vmem_est = (2 * t_tile * D0 * x.dtype.itemsize          # x   (double-buffered)
                + 2 * t_tile * H * out_bytes                 # out (double-buffered)
                + 2 * int(bias_p.size) * 4                   # bias
                + 2 * sum(int(w.size) * 2 for w in w_p)      # weights
                + 2 * t_tile * H_pad * 4)                    # f32 activations
    cp_kwargs = dict(dimension_semantics=("parallel", "parallel"))
    if vmem_est > 30 * 1024 * 1024:
        cp_kwargs["vmem_limit_bytes"] = min(2 * vmem_est, 64 * 1024 * 1024)

    return pl.pallas_call(
        functools.partial(_prenet_fused_kernel, L, H),
        out_shape=jax.ShapeDtypeStruct((B, T, H), out_dtype),
        grid_spec=pl.GridSpec(
            grid=grid,
            in_specs=in_specs,
            out_specs=pl.BlockSpec((1, t_tile, H), lambda b, t: (b, t, 0)),
        ),
        compiler_params=pltpu.CompilerParams(**cp_kwargs),
    )(x, bias_p, *w_p)


def prenet_forward(params, x, speaker_embedding, **kwargs):
    """Convenience wrapper; for repeated calls cache prepare_prenet_params()."""
    prepared = prepare_prenet_params(params, speaker_embedding)
    return prenet_apply(prepared, x, **kwargs)


# --------------------------------------------------------------------------
# Parameter init (mirrors nn.Linear / weight_norm shapes) and references.
# --------------------------------------------------------------------------
def init_prenet_params(key, mel_spec_dim, hidden_dim, speaker_embedding_dim,
                       n_proj_layers):
    params = []
    for i in range(n_proj_layers):
        in_dim = mel_spec_dim if i == 0 else hidden_dim
        key, k1, k2, k3, k4 = jax.random.split(key, 5)
        bound_fc = 1.0 / jnp.sqrt(in_dim)
        w = jax.random.uniform(k1, (hidden_dim, in_dim), jnp.float32,
                               -bound_fc, bound_fc)
        b = jax.random.uniform(k2, (hidden_dim,), jnp.float32,
                               -bound_fc, bound_fc)
        bound_sp = 1.0 / jnp.sqrt(speaker_embedding_dim)
        v = jax.random.uniform(k3, (hidden_dim, speaker_embedding_dim),
                               jnp.float32, -bound_sp, bound_sp)
        bs = jax.random.uniform(k4, (hidden_dim,), jnp.float32,
                                -bound_sp, bound_sp)
        g = jnp.linalg.norm(v, axis=1)   # weight_norm(dim=0) init
        params.append(dict(w=w, b=b, v=v, g=g, bs=bs))
    return params


def prenet_reference_f32(params, x, speaker_embedding):
    """Pure-f32 semantic reference (matches the PyTorch eval-mode forward)."""
    out = x
    for p in params:
        row_norm = jnp.linalg.norm(p["v"], axis=1, keepdims=True)
        ws = p["v"] * (p["g"][:, None] / row_norm)
        s = speaker_embedding @ ws.T + p["bs"]
        s = s / (1.0 + jnp.abs(s))
        out = out @ p["w"].T + p["b"] + s[:, None, :]
        out = jnp.maximum(out, 0.0)
    return out


def prenet_reference_mixed(params, x, speaker_embedding):
    """Mirrors the kernel arithmetic: bf16 matmul operands, f32 accumulate."""
    L = len(params)
    out = x.astype(jnp.bfloat16)
    for i, p in enumerate(params):
        row_norm = jnp.linalg.norm(p["v"], axis=1, keepdims=True)
        ws = p["v"] * (p["g"][:, None] / row_norm)
        s = speaker_embedding @ ws.T + p["bs"]
        s = s / (1.0 + jnp.abs(s))
        wt = p["w"].T.astype(jnp.bfloat16)
        y = jax.lax.dot_general(out, wt, (((2,), (0,)), ((), ())),
                                preferred_element_type=jnp.float32)
        y = jnp.maximum(y + (p["b"][None, :] + s)[:, None, :], 0.0)
        out = y.astype(jnp.bfloat16) if i + 1 < L else y
    return out


if __name__ == "__main__":
    B, T_mel = 2, 8
    mel_spec_dim, hidden_dim, speaker_embedding_dim = 16, 32, 8
    n_proj_layers = 2

    key = jax.random.PRNGKey(0)
    kx, ks, kp = jax.random.split(key, 3)
    x = jax.random.normal(kx, (B, T_mel, mel_spec_dim), jnp.float32)
    spk = jax.random.normal(ks, (B, speaker_embedding_dim), jnp.float32)

    params = init_prenet_params(kp, mel_spec_dim, hidden_dim,
                                speaker_embedding_dim, n_proj_layers)

    # Host-side glue: computed ONCE per utterance and reused across calls.
    prepared = prepare_prenet_params(params, spk)

    out = jax.block_until_ready(prenet_apply(prepared, x))
    assert out.shape == (B, T_mel, hidden_dim)
    assert out.dtype == jnp.bfloat16

    out_f32 = out.astype(jnp.float32)
    ref_mixed = prenet_reference_mixed(params, x, spk)
    ref_f32 = prenet_reference_f32(params, x, spk)

    err_mixed = float(jnp.max(jnp.abs(out_f32 - ref_mixed)))
    err_f32 = float(jnp.max(jnp.abs(out_f32 - ref_f32)))
    # Tight check vs the bf16-matmul/f32-accumulate reference (only the final
    # bf16 output rounding + accumulation-order differences remain).
    assert jnp.allclose(out_f32, ref_mixed, atol=2e-2, rtol=2e-2), err_mixed
    # Looser check vs the full-f32 PyTorch-equivalent semantics.
    assert jnp.allclose(out_f32, ref_f32, atol=7.5e-2, rtol=7.5e-2), err_f32

    print("KERNEL_OK")
</pallas_src>

<mosaic_0001>
module attributes {stable_mosaic.version = 11 : i64} {
  func.func @_prenet_fused_kernel(%arg0: i32, %arg1: i32, %arg2: memref<1x8x16xf32, #tpu.memory_space<vmem>>, %arg3: memref<1x2x128xf32, #tpu.memory_space<vmem>>, %arg4: memref<16x128xbf16, #tpu.memory_space<vmem>>, %arg5: memref<128x128xbf16, #tpu.memory_space<vmem>>, %arg6: memref<1x8x32xbf16, #tpu.memory_space<vmem>>) attributes {dimension_semantics = [#tpu.dimension_semantics<parallel>, #tpu.dimension_semantics<parallel>], iteration_bounds = array<i64: 2, 1>, scalar_prefetch = 0 : i64, scratch_operands = 0 : i64, tpu.core_type = #tpu.core_type<tc>, window_params = [{transform_indices = @transform_0, window_bounds = array<i64: 1, 8, 16>}, {transform_indices = @transform_1, window_bounds = array<i64: 1, 2, 128>}, {pipeline_mode = #tpu.pipeline_mode<synchronous>, transform_indices = @transform_2, window_bounds = array<i64: 16, 128>}, {pipeline_mode = #tpu.pipeline_mode<synchronous>, transform_indices = @transform_3, window_bounds = array<i64: 128, 128>}, {transform_indices = @transform_4, window_bounds = array<i64: 1, 8, 32>}]} {
    %c0 = arith.constant 0 : index
    %c0_0 = arith.constant 0 : index
    %c0_1 = arith.constant 0 : index
    %0 = vector.load %arg2[%c0, %c0_0, %c0_1] : memref<1x8x16xf32, #tpu.memory_space<vmem>>, vector<1x8x16xf32>
    %1 = vector.shape_cast %0 : vector<1x8x16xf32> to vector<8x16xf32>
    %2 = arith.truncf %1 : vector<8x16xf32> to vector<8x16xbf16>
    %c0_2 = arith.constant 0 : index
    %c0_3 = arith.constant 0 : index
    %3 = vector.load %arg4[%c0_2, %c0_3] : memref<16x128xbf16, #tpu.memory_space<vmem>>, vector<16x128xbf16>
    %cst = arith.constant dense<0.000000e+00> : vector<8x128xf32>
    %4 = tpu.matmul %2, %3, %cst {dimension_numbers = #tpu.dot_dimension_numbers<[1], [0], [0], [1], [0, 0, 1, 1], [], []>} : vector<8x16xbf16>, vector<16x128xbf16>, vector<8x128xf32> -> vector<8x128xf32>
    %c0_4 = arith.constant 0 : index
    %c0_5 = arith.constant 0 : index
    %c0_6 = arith.constant 0 : index
    %5 = vector.load %arg3[%c0_4, %c0_5, %c0_6] : memref<1x2x128xf32, #tpu.memory_space<vmem>>, vector<1x1x128xf32>
    %6 = vector.shape_cast %5 : vector<1x1x128xf32> to vector<1x128xf32>
    %7 = vector.broadcast %6 : vector<1x128xf32> to vector<8x128xf32>
    %8 = arith.addf %4, %7 : vector<8x128xf32>
    %cst_7 = arith.constant 0.000000e+00 : f32
    %9 = vector.broadcast %cst_7 : f32 to vector<8x128xf32>
    %10 = arith.maximumf %8, %9 : vector<8x128xf32>
    %11 = arith.truncf %10 : vector<8x128xf32> to vector<8x128xbf16>
    %c0_8 = arith.constant 0 : index
    %c0_9 = arith.constant 0 : index
    %12 = vector.load %arg5[%c0_8, %c0_9] : memref<128x128xbf16, #tpu.memory_space<vmem>>, vector<128x128xbf16>
    %cst_10 = arith.constant dense<0.000000e+00> : vector<8x128xf32>
    %13 = tpu.matmul %11, %12, %cst_10 {dimension_numbers = #tpu.dot_dimension_numbers<[1], [0], [0], [1], [0, 0, 1, 1], [], []>} : vector<8x128xbf16>, vector<128x128xbf16>, vector<8x128xf32> -> vector<8x128xf32>
    %c0_11 = arith.constant 0 : index
    %c1 = arith.constant 1 : index
    %c0_12 = arith.constant 0 : index
    %14 = vector.load %arg3[%c0_11, %c1, %c0_12] : memref<1x2x128xf32, #tpu.memory_space<vmem>>, vector<1x1x128xf32>
    %15 = vector.shape_cast %14 : vector<1x1x128xf32> to vector<1x128xf32>
    %16 = vector.broadcast %15 : vector<1x128xf32> to vector<8x128xf32>
    %17 = arith.addf %13, %16 : vector<8x128xf32>
    %cst_13 = arith.constant 0.000000e+00 : f32
    %18 = vector.broadcast %cst_13 : f32 to vector<8x128xf32>
    %19 = arith.maximumf %17, %18 : vector<8x128xf32>
    %20 = vector.extract_strided_slice %19 {offsets = [0, 0], sizes = [8, 32], strides = [1, 1]} : vector<8x128xf32> to vector<8x32xf32>
    %21 = arith.truncf %20 : vector<8x32xf32> to vector<8x32xbf16>
    %c0_14 = arith.constant 0 : index
    %c0_15 = arith.constant 0 : index
    %c0_16 = arith.constant 0 : index
    %22 = vector.load %arg6[%c0_14, %c0_15, %c0_16] : memref<1x8x32xbf16, #tpu.memory_space<vmem>>, vector<1x8x32xbf16>
    %23 = vector.shape_cast %22 : vector<1x8x32xbf16> to vector<8x32xbf16>
    %24 = vector.shape_cast %21 : vector<8x32xbf16> to vector<1x8x32xbf16>
    tpu.vector_store %arg6[%c0_14, %c0_15, %c0_16], %24 {strides = array<i32>} : memref<1x8x32xbf16, #tpu.memory_space<vmem>>, vector<1x8x32xbf16>,
    return
  }
  func.func @transform_0(%arg0: i32, %arg1: i32) -> (i32, i32, i32) {
    %c0_i32 = arith.constant 0 : i32
    %c0_i32_0 = arith.constant 0 : i32
    return %arg0, %arg1, %c0_i32 : i32, i32, i32
  }
  func.func @transform_1(%arg0: i32, %arg1: i32) -> (i32, i32, i32) {
    %c0_i32 = arith.constant 0 : i32
    %c0_i32_0 = arith.constant 0 : i32
    %c0_i32_1 = arith.constant 0 : i32
    return %arg0, %c0_i32, %c0_i32_0 : i32, i32, i32
  }
  func.func @transform_2(%arg0: i32, %arg1: i32) -> (i32, i32) {
    %c0_i32 = arith.constant 0 : i32
    %c0_i32_0 = arith.constant 0 : i32
    %c0_i32_1 = arith.constant 0 : i32
    return %c0_i32, %c0_i32_0 : i32, i32
  }
  func.func @transform_3(%arg0: i32, %arg1: i32) -> (i32, i32) {
    %c0_i32 = arith.constant 0 : i32
    %c0_i32_0 = arith.constant 0 : i32
    %c0_i32_1 = arith.constant 0 : i32
    return %c0_i32, %c0_i32_0 : i32, i32
  }
  func.func @transform_4(%arg0: i32, %arg1: i32) -> (i32, i32, i32) {
    %c0_i32 = arith.constant 0 : i32
    %c0_i32_0 = arith.constant 0 : i32
    return %arg0, %arg1, %c0_i32 : i32, i32, i32
  }
}

</mosaic_0001>

<bundles_post_ra>
// kernel: tpu_custom_call.1
= control target key start
LH: loop header
LB: loop body
LE: loop exit
PB: predicated region body
PF: predicated region fallthrough
CT: control target
= control target key end

     0   :  { %s1223_s0 = inlined_call_operand.hbm [shape: f32[2,8,16], index: 0, kind: input, shape index: {}]   ;;  %s1224_s1 = inlined_call_operand.hbm [shape: f32[2,2,128], index: 1, kind: input, shape index: {}]   ;;  %s1225_s2 = inlined_call_operand.hbm [shape: bf16[16,128], index: 2, kind: input, shape index: {}]   ;;  %s1226_s3 = inlined_call_operand.hbm [shape: bf16[128,128], index: 3, kind: input, shape index: {}]   ;;  %s1227_s4 = inlined_call_operand.hbm [shape: bf16[2,8,32], index: 4, kind: output, shape index: {}]  }
   0x1   :  { %1230 = sst [smem:[#allocation17_spill]] %s1223_s0 }
   0x2   :  { %1231 = sst [smem:[#allocation18_spill]] %s1225_s2 }
   0x3   :  { %1232 = sst [smem:[#allocation19_spill]] %s1226_s3 }
   0x4   :  { %9 = vsyncpa [#allocation3], 0 }
   0x5   :  { %11 = vsyncpa [#allocation3 + $0x1], 0 }
   0x6   :  { %12 = vsyncpa [#allocation6], 0 }
   0x7   :  { %14 = vsyncpa [#allocation6 + $0x1], 0 }
   0x8   :  { %15 = vsyncpa [#allocation9], 0 }
   0x9   :  { %16 = vsyncpa [#allocation4], 0 }
   0xa   :  { %18 = vsyncpa [#allocation4 + $0x1], 0  ;;  %s1014_s15 = smov 0   ;;  %s1016_s16 = smov 0  }
   0xb   :  { %s1018_s17 = smov 0   ;;  %s1020_s18 = smov 0  }
   0xc   :  { %s1022_s19 = smov 0   ;;  %s1024_s20 = smov 0  }
   0xd LB: > { %s1045_s21 = sadd.s32 4294967295, %s978_s20   ;;  %s609_s22 = sadd.s32 4294967294, %s978_s20   ;;  %s978_s20 = sphi %s1024_s20, %s24_s20   ;;  %s974_s19 = sphi %s1022_s19, %s1255_s19   ;;  %s970_s18 = sphi %s1020_s18, %s1254_s18   ;;  %s966_s17 = sphi %s1018_s17, %s1253_s17   ;;  %s962_s16 = sphi %s1016_s16, %s1252_s16   ;;  %s958_s15 = sphi %s1014_s15, %s1251_s15  }
   0xe   : > { %p58_p0 = scmp.ne.s32.totalorder %s962_s16, %s958_s15  ;;  %p1228_p1 = scmp.eq.s32.totalorder %s1045_s21, 0 }
   0xf   : > { %p158_p3 = scmp.eq.s32.totalorder %s609_s22, 1  ;;  %p610_p5 = scmp.ge.s32.totalorder %s978_s20, 1 }
  0x10   : > { %p1054_p4 = por %p1228_p1, %p58_p0  ;;  %p165_p7 = scmp.lt.s32.totalorder %s978_s20, 3 }
  0x11   : > { %p1059_p6 = por %p158_p3, %p58_p0  ;;  %s980_s26 = smov [#allocation7]  }
  0x12   : > { %p1064_p8 = pnand %p610_p5, %p165_p7  ;;  %s177_s27 = sshll.u32 %s980_s26, 4  ;;  %s178_s27 = int_to_ptr.vmem [resolvable:$true] %s177_s27 }
  0x13   : > { %s1234_s24 = scalar_select %p1059_p6, 1, 0 }
  0x14   : > { %p691_p9 = pneg %p1064_p8  ;;  %s981_s29 = smov [#allocation8]  }
  0x15   : > { %s190_s30 = sshll.u32 %s981_s29, 4  ;;  %s789_s5 = scalar_lea.vmem %s178_s27, 128  ;;  %s191_s30 = int_to_ptr.vmem [resolvable:$true] %s190_s30 }
  0x16   : > { %p1073_p11 = pnand %p691_p9, %p1228_p1  ;;  %p790_p13 = scmp.ne.s32.totalorder %s178_s27, %s789_s5 }
  0x17   : > { %p797_p5 = scmp.lt.s32.totalorder %s178_s27, %s178_s27  ;;  %p798_p7 = scmp.lt.s32.totalorder %s789_s5, %s789_s5 }
  0x18   : > { %p780_p12 = pneg %p1073_p11 }
  0x19   : > { %p799_p10 = por %p798_p7, %p797_p5 }
  0x1a   : > { %p792_p0 = pnand %p790_p13, %p780_p12 }
  0x1c   : > { %p793_p3 = pneg %p792_p0 }
  0x1e   : > { %p800_p9 = pnand %p799_p10, %p793_p3 }
  0x20   : > { %803 = shalt.err (!%p800_p9)
}
  0x21   : > { %s982_s6 = smov 64   ;;  %s983_s7 = smov 4  }
  0x22   : > { %s1237_s2 = sld [smem:[#allocation18_spill]]  ;;  %s815_s10 = scalar_lea.vmem %s191_s30, 1024 }
  0x23   : > { %p816_p1 = scmp.ne.s32.totalorder %s191_s30, %s815_s10  ;;  %p823_p2 = scmp.lt.s32.totalorder %s191_s30, %s191_s30 }
  0x24   : > { %p824_p6 = scmp.lt.s32.totalorder %s815_s10, %s815_s10 }
  0x25   : > { %p818_p13 = pnand %p816_p1, %p780_p12 }
  0x26   : > { %p825_p5 = por %p824_p6, %p823_p2 }
  0x27   : > { %p819_p0 = pneg %p818_p13 }
  0x28   : > { %694 = dma.hbm_to_vmem [thread:$0]  (!%p1073_p11), %s1237_s2, 128, %s178_s27, [#allocation6], %s982_s6, %s982_s6, %s983_s7  }
  0x29   : > { %p826_p10 = pnand %p825_p5, %p819_p0 }
  0x2b   : > { %829 = shalt.err (!%p826_p10)
}
  0x2c   : > { %s1238_s3 = sld [smem:[#allocation19_spill]]  ;;  %s36_s13 = sadd.s32 1, %s974_s19 }
  0x2d   : > { %s45_s14 = sadd.s32 1, %s966_s17  ;;  %p38_p1 = scmp.ge.s32.totalorder %s36_s13, 2 }
  0x2e   : > { %p52_p2 = scmp.ne.s32.totalorder %s966_s17, %s962_s16  ;;  %p53_p6 = scmp.eq.s32.totalorder %s978_s20, 0 }
  0x2f   : > { %p711_p12 = scmp.lt.s32.totalorder %s978_s20, 2  ;;  %s1257_s13 = smov (%p38_p1, %s36_s13), 0 }
  0x30   : > { %1239 = sst [smem:[#allocation16_spill]] %s1257_s13  ;;  %p54_p3 = por %p53_p6, %p52_p2 }
  0x31   : > { %p1240_p7 = scmp.eq.s32.totalorder %s1045_s21, 1  ;;  %s40_s26 = ssub.s32 %s974_s19, %s1257_s13 }
  0x32   : > { %697 = dma.hbm_to_vmem [thread:$0]  (!%p1073_p11), %s1238_s3, 1024, %s191_s30, [#allocation9], %s982_s6, %s982_s6, %s983_s7  }
  0x33   : > { %p1105_p9 = por %p1240_p7, %p52_p2  ;;  %s1112_s27 = sand.u32 1, %s966_s17  }
  0x34   : > { %p43_p11 = scmp.eq.s32.totalorder %s40_s26, 0  ;;  %s614_s28 = sshll.u32 %s1112_s27, 3 }
  0x35   : > { %s615_s29 = sshll.u32 %s974_s19, 7  ;;  %s1242_s0 = sld [smem:[#allocation17_spill]] }
  0x36   : > { %s1117_s30 = scalar_select %p43_p11, %s966_s17, %s45_s14  }
  0x37   : > { %s208_s8 = scalar_lea.vmem [#allocation2], %s614_s28  ;;  %p1124_p13 = pnand %p711_p12, %p54_p3 }
  0x38   : > { %s216_s9 = sshll.u32 %s208_s8, 4  ;;  %s223_s11 = sand.u32 1, %s978_s20   ;;  %s217_s9 = int_to_ptr.vmem [resolvable:$true] %s216_s9 }
  0x39   : > { %s205_s12 = scalar_lea.sflag [#allocation3], %s1112_s27  ;;  %p832_p0 = pneg %p1124_p13 }
  0x3a   : > { %s843_s14 = scalar_lea.vmem %s217_s9, 128  ;;  %s984_s26 = smov [#allocation2]  }
  0x3b   : > { %s214_s7 = scalar_lea.hbm %s1242_s0, %s615_s29  ;;  %p844_p5 = scmp.ne.s32.totalorder %s217_s9, %s843_s14 }
  0x3c   : > { %s848_s28 = sshll.u32 %s984_s26, 4  ;;  %s849_s28 = int_to_ptr.vmem [resolvable:$false] %s848_s28 }
  0x3d   : > { %p846_p10 = pnand %p844_p5, %p832_p0  ;;  %s850_s29 = scalar_lea.vmem %s849_s28, 256 }
  0x3e   : > { %p851_p2 = scmp.lt.s32.totalorder %s217_s9, %s849_s28  ;;  %p852_p6 = scmp.lt.s32.totalorder %s850_s29, %s843_s14 }
  0x3f   : > { %p847_p1 = pneg %p846_p10 }
  0x40   : > { %p853_p12 = por %p852_p6, %p851_p2 }
  0x42   : > { %p854_p3 = pnand %p853_p12, %p847_p1 }
  0x44   : > { %857 = shalt.err (!%p854_p3)
}
  0x45   : > { %701 = dma.hbm_to_vmem [thread:$0]  (!%p1124_p13), %s214_s7, 128, %s217_s9, %s205_s12  }
  0x46   : > { %s616_s5 = sshll.u32 %s1112_s27, 1  ;;  %s617_s6 = sshll.u32 %s974_s19, 5 }
  0x47   : > { %s232_s2 = scalar_lea.hbm %s1224_s1, %s617_s6  ;;  %s227_s26 = scalar_lea.vmem [#allocation5], %s616_s5 }
  0x48   : > { %s234_s3 = sshll.u32 %s227_s26, 4  ;;  %s224_s28 = scalar_lea.sflag [#allocation6], %s223_s11  ;;  %s235_s3 = int_to_ptr.vmem [resolvable:$true] %s234_s3 }
  0x49   : > { %s871_s14 = scalar_lea.vmem %s235_s3, 32  ;;  %s985_s29 = smov [#allocation5]  }
  0x4a   : > { %p872_p7 = scmp.ne.s32.totalorder %s235_s3, %s871_s14  ;;  %s876_s13 = sshll.u32 %s985_s29, 4  ;;  %s877_s13 = int_to_ptr.vmem [resolvable:$false] %s876_s13 }
  0x4b   : > { %s878_s7 = scalar_lea.vmem %s877_s13, 64  ;;  %p879_p10 = scmp.lt.s32.totalorder %s235_s3, %s877_s13 }
  0x4c   : > { %p874_p11 = pnand %p872_p7, %p832_p0  ;;  %p880_p1 = scmp.lt.s32.totalorder %s878_s7, %s871_s14 }
  0x4e   : > { %p875_p5 = pneg %p874_p11  ;;  %p881_p2 = por %p880_p1, %p879_p10 }
  0x50   : > { %p882_p6 = pnand %p881_p2, %p875_p5 }
  0x52   : > { %885 = shalt.err (!%p882_p6)
}
  0x53   : > { %704 = dma.hbm_to_vmem [thread:$0]  (!%p1124_p13), %s232_s2, 32, %s235_s3, %s224_s28  }
  0x54   : > { %243 = sbr.rel (%p1064_p8) target bundleno = 516 (0x204), region = 36  ;;  %s1150_s0 = sand.u32 (!%p1064_p8), 1, %s962_s16  }
  0x55   : > { %s619_s27 = sshll.u32 (!%p1064_p8), %s1150_s0, 3  ;;  %s246_s9 = scalar_lea.sflag (!%p1064_p8), [#allocation3], %s1150_s0 }
  0x56   : > { %s249_s11 = scalar_lea.vmem (!%p1064_p8), [#allocation2], %s619_s27 }
  0x59   : > { %937 = dma.done.wait (%p1054_p4), %s246_s9, 128  }
  0x5a   : > { %939 = vsyncadd (%p1054_p4), %s246_s9, 4294967168  ;;  %s254_s2 = sand.u32 1, %s1045_s21   ;;  %s620_s3 = sshll.u32 %s1150_s0, 1 }
  0x5b   : > { %s255_s25 = scalar_lea.sflag [#allocation6], %s254_s2  ;;  %s1160_s13 = scalar_lea.vmem [#allocation5], %s620_s3 }
  0x5c   : > { %941 = dma.done.wait (%p1054_p4), %s255_s25, 32  }
  0x5d   : > { %943 = vsyncadd (%p1054_p4), %s255_s25, 4294967264  ;;  %p1244_p8 = scmp.eq.s32.totalorder %s1045_s21, 0 }
  0x5f   : > { %945 = dma.done.wait (%p1244_p8), [#allocation6], 128   ;;  %p1245_p13 = pmov %p1244_p8 }
  0x60   : > { %p1246_p0 = pmov %p1244_p8 }
  0x61   : > { %947 = vsyncadd (%p1245_p13), [#allocation6], 4294967168 }
  0x62   : > { %949 = dma.done.wait (%p1246_p0), [#allocation9], 1024   ;;  %p1247_p12 = pmov %p1246_p0 }
  0x63   : > { %v986_v0 = vmov 0.0   ;;  %vm987_vm0 = vmmov 0   ;;  %v769_v1 = vld [vmem:[#allocation7] sm:$0xff]   ;;  %v297_v2 = vld [vmem:[%s249_s11] sm:$0xff]  ;;  %vm312_vm1 = vcmask 130048   ;;  %s623_s21 = sshll.u32 %s1150_s0, 2 }
  0x64   : > { %951 = vsyncadd (%p1247_p12), [#allocation9], 4294966272  ;;  %651 = vmatprep.subr.bf16.mxu0 %v986_v0  ;;  %653 = vmatprep.mubr.msk.bf16.mxu0 %vm987_vm0, %v986_v0  ;;  %v298_v3 = vpack.c.bf16 %v297_v2, %v297_v2  ;;  %v770_v4 = vld [vmem:[#allocation8 + $0x38] sm:$0xff]   ;;  %v771_v5 = vld [vmem:[#allocation8 + $0x30] sm:$0xff]   ;;  %s637_s23 = sshll.u32 %s970_s18, 6  ;;  %s295_s10 = scalar_lea.vmem [#allocation10], %s623_s21 }
  0x65   : > { %657 = vmatprep.subr.bf16.mxu1 %v986_v0  ;;  %673 = vmatprep.mubr.msk.bf16.mxu1 %vm987_vm0, %v986_v0  ;;  %v772_v6 = vld [vmem:[#allocation8 + $0x28] sm:$0xff]   ;;  %v773_v7 = vld [vmem:[#allocation8 + $0x20] sm:$0xff]   ;;  %v774_v8 = vld [vmem:[#allocation8 + $0x18] sm:$0xff]   ;;  %s486_s12 = sshll.u32 %s295_s10, 4  ;;  %vm469_vm2 = vcmask 257024   ;;  %s1181_s8 = scalar_lea.hbm %s1227_s4, %s637_s23  ;;  %s487_s12 = int_to_ptr.vmem [resolvable:$true] %s486_s12 }
  0x66   : > { %652 = vmatpush3.bf16.msra.mxu0 %v769_v1  ;;  %658 = vmatpush3.bf16.msra.mxu1 %v770_v4  ;;  %v775_v9 = vld [vmem:[#allocation8 + $0x10] sm:$0xff]   ;;  %v776_v10 = vld [vmem:[#allocation8 + $0x8] sm:$0xff]   ;;  %v777_v11 = vld [vmem:[#allocation8] sm:$0xff]   ;;  %s472_s26 = scalar_lea.sflag [#allocation4], %s1150_s0  ;;  %s886_s28 = scalar_lea.vmem %s487_s12, 64 }
  0x67   : > { %659 = vmatprep.subr.bf16.mxu1 %v986_v0  ;;  %v624_v12 = vld [vmem:[%s1160_s13] ss:$0 sm:$0xff]  ;;  %v627_v20 = vld [vmem:[%s1160_s13 + $0x1] ss:$0 sm:$0xff]  ;;  %p887_p4 = scmp.ne.s32.totalorder %s487_s12, %s886_s28  ;;  %s988_s18 = smov [#allocation10]  }
  0x68   : > { %s890_s14 = sshll.u32 %s988_s18, 4  ;;  %s891_s14 = int_to_ptr.vmem [resolvable:$false] %s890_s14 }
  0x69   : > { %654 = vmatmul.mubr.msk.bf16.vlgmr.msra.gmra.mxu0 %vm312_vm1, %v298_v3  ;;  %p888_p3 = pnand %p887_p4, %p1105_p9  ;;  %s892_s29 = scalar_lea.vmem %s891_s14, 128 }
  0x6a   : > { %660 = vmatpush3.bf16.msra.mxu1 %v771_v5  ;;  %p893_p11 = scmp.lt.s32.totalorder %s487_s12, %s891_s14  ;;  %p894_p5 = scmp.lt.s32.totalorder %s892_s29, %s886_s28 }
  0x6b   : > { %661 = vmatprep.subr.bf16.mxu1 %v986_v0  ;;  %p889_p7 = pneg %p888_p3 }
  0x6c   : > { %p895_p10 = por %p894_p5, %p893_p11 }
  0x6e   : > { %662 = vmatpush3.bf16.msra.mxu1 %v772_v6  ;;  %p896_p1 = pnand %p895_p10, %p889_p7 }
  0x6f   : > { %663 = vmatprep.subr.bf16.mxu1 %v986_v0 }
  0x72   : > { %664 = vmatpush3.bf16.msra.mxu1 %v773_v7 }
  0x73   : > { %665 = vmatprep.subr.bf16.mxu1 %v986_v0 }
  0x76   : > { %666 = vmatpush3.bf16.msra.mxu1 %v774_v8 }
  0x77   : > { %667 = vmatprep.subr.bf16.mxu1 %v986_v0 }
  0x7a   : > { %668 = vmatpush3.bf16.msra.mxu1 %v775_v9 }
  0x7b   : > { %669 = vmatprep.subr.bf16.mxu1 %v986_v0 }
  0x7e   : > { %670 = vmatpush3.bf16.msra.mxu1 %v776_v10 }
  0x7f   : > { %671 = vmatprep.subr.bf16.mxu1 %v986_v0 }
  0x82   : > { %672 = vmatpush3.bf16.msra.mxu1 %v777_v11 }
 0x129   : > { %v350_v13 = vpop.f32.mrf.mxu0 }
 0x12a   : > { %v351_v14 = vadd.f32 %v624_v12, %v350_v13 }
 0x12b   : > { %v655_v15 = vpop.f32.mrf.mxu0 }
 0x12c   : > { %v356_v16 = vmax.f32 %v351_v14, 0.0 }
 0x12d   : > { %v353_v17 = vpop.f32.mrf.mxu0 }
 0x12e   : > { %v357_v18 = vpack.c.bf16 %v356_v16, %v356_v16 }
 0x12f   : > { %v656_v19 = vpop.f32.mrf.mxu0 }
 0x130   : > { %674 = vmatmul.mubr.bf16.vlgmr.msra.gmra.mxu1 %v357_v18 }
 0x1f0   : > { %v461_v21 = vpop.f32.mrf.mxu1 }
 0x1f1   : > { %v462_v22 = vadd.f32 %v627_v20, %v461_v21 }
 0x1f2   : > { %v675_v23 = vpop.f32.mrf.mxu1 }
 0x1f3   : > { %v467_v24 = vmax.f32 %v462_v22, 0.0 }
 0x1f4   : > { %v464_v25 = vpop.f32.mrf.mxu1 }
 0x1f5   : > { %v468_v26 = vpack.c.bf16 %v467_v24, %v467_v24 }
 0x1f6   : > { %v676_v27 = vpop.f32.mrf.mxu1 }
 0x1f7   : > { %470 = vst.msk [vmem:[%s295_s10] sm:$0xf] %vm469_vm2, %v468_v26 }
 0x1f8   : > { %899 = shalt.err (!%p896_p1)
}
 0x1f9   : > { %s900_s7 = scalar_lea.hbm %s1181_s8, 64  ;;  %s904_s9 = scalar_lea.hbm %s1227_s4, 128 }
 0x1fa   : > { %p901_p2 = scmp.ne.s32.totalorder %s1181_s8, %s900_s7  ;;  %p905_p13 = scmp.lt.s32.totalorder %s1181_s8, %s1227_s4 }
 0x1fb   : > { %p906_p0 = scmp.lt.s32.totalorder %s904_s9, %s900_s7 }
 0x1fc   : > { %p902_p6 = pnand %p901_p2, %p1105_p9 }
 0x1fd   : > { %p907_p12 = por %p906_p0, %p905_p13 }
 0x1fe   : > { %p903_p8 = pneg %p902_p6 }
 0x200   : > { %p908_p4 = pnand %p907_p12, %p903_p8 }
 0x202   : > { %911 = shalt.err (!%p908_p4)
}
 0x203   : > { %689 = dma.vmem_to_hbm [thread:$0]  (%p1105_p9), %s487_s12, 64, %s1181_s8, %s472_s26  }
 0x204 PF: > { %s498_s3 = sand.u32 1, %s958_s15   ;;  %p1248_p3 = scmp.ne.s32.totalorder %s1234_s24, 0 }
 0x205   : > { %p1249_p7 = scmp.ge.s32.totalorder %s978_s20, 2  ;;  %s499_s25 = scalar_lea.sflag [#allocation4], %s498_s3 }
 0x207   : > { %p706_p11 = pnand %p1249_p7, %p1248_p3 }
 0x209   : > { %p707_p5 = pneg %p706_p11 }
 0x20b   : > { %953 = dma.done.wait (%p707_p5), %s499_s25, 64  }
 0x20c   : > { %955 = vsyncadd (%p707_p5), %s499_s25, 4294967232  ;;  %s24_s20 = sadd.s32 1, %s978_s20   ;;  %s1250_s22 = sld [smem:[#allocation16_spill]] }
 0x20d   : > { %p21_p10 = scmp.ge.s32.totalorder %s24_s20, 4   ;;  %s1251_s15 = smov %s962_s16 }
 0x20e   : > { %s1252_s16 = smov %s966_s17  ;;  %s1253_s17 = smov %s1117_s30 }
 0x20f   : > { %s1254_s18 = smov %s974_s19  ;;  %23 = sbr.rel (!%p21_p10) target bundleno = 13 (0xd), region = 102 }
 0x212   : > { %s1255_s19 = smov %s1250_s22 }
 0x214   :  { %504 = vsyncpa [#allocation3], 1 }
 0x215   :  { %506 = vsyncpa [#allocation3 + $0x1], 1 }
 0x216   :  { %507 = vsyncpa [#allocation6], 1 }
 0x217   :  { %509 = vsyncpa [#allocation6 + $0x1], 1 }
 0x218   :  { %510 = vsyncpa [#allocation9], 1 }
 0x219   :  { %511 = vsyncpa [#allocation4], 1 }
 0x21a   :  { %513 = vsyncpa [#allocation4 + $0x1], 1 }

</bundles_post_ra>
